<compile_context>
chip_gen: v7x
topology: tpu7x:2x2x1
jax: 0.10.0
libtpu: 0.0.40
codegen_flags: <defaults>
</compile_context>

<pallas_src>
import functools
import math

import jax
import jax.numpy as jnp
from jax.experimental import pallas as pl
from jax.experimental.pallas import tpu as pltpu


def _timestep_embedder_kernel(ts_ref, pe_ref, w_ref, b_ref, out_ref, x_buf, sems,
                              *, use_bf16_matmul: bool):
    B, d = out_ref.shape
    max_len = pe_ref.shape[0]

    # --- Gather: B row DMAs HBM -> VMEM scratch, all in flight before any wait ---
    for i in range(B):  # B is small & static (unrolled)
        t = jnp.minimum(jnp.maximum(ts_ref[i], 0), max_len - 1)  # bounds-safe offset
        pltpu.make_async_copy(pe_ref.at[pl.ds(t, 1)],
                              x_buf.at[pl.ds(i, 1)],
                              sems.at[i]).start()
    for i in range(B):
        pltpu.make_async_copy(pe_ref.at[pl.ds(0, 1)],
                              x_buf.at[pl.ds(i, 1)],
                              sems.at[i]).wait()

    x = x_buf[...]                      # (B, d) f32
    w1 = w_ref[0]                       # (d, d)
    w2 = w_ref[1]                       # (d, d)
    if use_bf16_matmul:                 # MXU-native operands at production widths
        x, w1, w2 = x.astype(jnp.bfloat16), w1.astype(jnp.bfloat16), w2.astype(jnp.bfloat16)

    # --- Linear 1 + SiLU (MXU matmul, f32 accumulate; bias/activation in f32) ---
    h = jnp.dot(x, w1, preferred_element_type=jnp.float32) + b_ref[0:1, :]
    h = h * jax.nn.sigmoid(h)           # SiLU: EUP sigmoid + VPU mul, f32 (v5e-safe)
    if use_bf16_matmul:
        h = h.astype(jnp.bfloat16)

    # --- Linear 2 ---
    y = jnp.dot(h, w2, preferred_element_type=jnp.float32) + b_ref[1:2, :]
    out_ref[...] = y.astype(out_ref.dtype)


def timestep_embedder(timesteps, pe_table, w1, b1, w2, b2, *, use_bf16_matmul=False):
    """timesteps: (B,) int; pe_table: (max_len, d) f32; w*: (d, d) stored as x @ W
    (transpose of PyTorch nn.Linear weight); b*: (1, d).  Returns (B, d) f32."""
    B = timesteps.shape[0]
    max_len, d = pe_table.shape
    ts = timesteps.astype(jnp.int32)
    w_stack = jnp.stack([w1, w2], axis=0)         # (2, d, d): one VMEM DMA
    b_stack = jnp.concatenate([b1, b2], axis=0)   # (2, d):    one VMEM DMA

    kernel = functools.partial(_timestep_embedder_kernel, use_bf16_matmul=use_bf16_matmul)
    cost = pl.CostEstimate(
        flops=4 * B * d * d + 4 * B * d,
        transcendentals=B * d,
        bytes_accessed=(ts.size * 4            # timesteps
                        + B * d * 4            # gathered pe rows
                        + 2 * d * d * 4        # weights
                        + 2 * d * 4            # biases
                        + B * d * 4),          # output
    )

    return pl.pallas_call(
        kernel,
        out_shape=jax.ShapeDtypeStruct((B, d), jnp.float32),
        in_specs=[
            pl.BlockSpec(memory_space=pltpu.MemorySpace.SMEM),  # timesteps (B,)
            pl.BlockSpec(memory_space=pl.ANY),                  # pe table stays in HBM
            pl.BlockSpec(memory_space=pltpu.MemorySpace.VMEM),  # W1|W2 (2, d, d)
            pl.BlockSpec(memory_space=pltpu.MemorySpace.VMEM),  # b1|b2 (2, d)
        ],
        out_specs=pl.BlockSpec(memory_space=pltpu.MemorySpace.VMEM),
        scratch_shapes=[
            pltpu.VMEM((B, d), jnp.float32),     # gathered pe rows
            pltpu.SemaphoreType.DMA((B,)),       # one semaphore per row DMA
        ],
        cost_estimate=cost,
    )(ts, pe_table, w_stack, b_stack)


def make_pe_table(max_len: int, d_model: int) -> jnp.ndarray:
    """Same construction as PositionalEncoding.__init__ (pe[:, 0, :] slice)."""
    position = jnp.arange(max_len, dtype=jnp.float32)[:, None]                 # (L, 1)
    div_term = jnp.exp(
        jnp.arange(0, d_model, 2, dtype=jnp.float32) * (-math.log(10000.0) / d_model)
    )                                                                          # (d/2,)
    pe = jnp.zeros((max_len, d_model), dtype=jnp.float32)
    pe = pe.at[:, 0::2].set(jnp.sin(position * div_term))
    pe = pe.at[:, 1::2].set(jnp.cos(position * div_term))
    return pe


if __name__ == "__main__":
    latent_dim = 128   # d_model == latent_dim == time_embed_dim (lane-dense output)
    max_len = 512
    batch = 8          # fills a full sublane on the matmul LHS

    key = jax.random.PRNGKey(0)
    k1, k2, k3, k4, k5 = jax.random.split(key, 5)

    # Deterministic synthetic parameters (nn.Linear-style uniform init).
    lim = 1.0 / math.sqrt(latent_dim)
    w1 = jax.random.uniform(k1, (latent_dim, latent_dim), jnp.float32, -lim, lim)
    b1 = jax.random.uniform(k2, (1, latent_dim), jnp.float32, -lim, lim)
    w2 = jax.random.uniform(k3, (latent_dim, latent_dim), jnp.float32, -lim, lim)
    b2 = jax.random.uniform(k4, (1, latent_dim), jnp.float32, -lim, lim)

    pe_table = make_pe_table(max_len, latent_dim)
    timesteps = jax.random.randint(k5, (batch,), 0, max_len, dtype=jnp.int32)

    out = timestep_embedder(timesteps, pe_table, w1, b1, w2, b2)
    out = jax.block_until_ready(out)

    # Pure-JAX reference of the same forward pass.
    x_ref = pe_table[timesteps]                       # (B, d)
    h_ref = x_ref @ w1 + b1
    h_ref = h_ref * jax.nn.sigmoid(h_ref)
    y_ref = h_ref @ w2 + b2

    assert out.shape == (batch, latent_dim)
    assert jnp.allclose(out, y_ref, atol=1e-4, rtol=1e-5), float(jnp.max(jnp.abs(out - y_ref)))
    print("KERNEL_OK")
</pallas_src>

<mosaic_0001>
module attributes {stable_mosaic.version = 11 : i64} {
  func.func @_timestep_embedder_kernel(%arg0: memref<8xi32, #tpu.memory_space<smem>>, %arg1: memref<512x128xf32, #tpu.memory_space<any>>, %arg2: memref<2x128x128xf32, #tpu.memory_space<vmem>>, %arg3: memref<2x128xf32, #tpu.memory_space<vmem>>, %arg4: memref<8x128xf32, #tpu.memory_space<vmem>>, %arg5: memref<8x128xf32, #tpu.memory_space<vmem>>, %arg6: memref<8x!tpu.dma_semaphore, #tpu.memory_space<semaphore_mem>>) attributes {dimension_semantics = [], scalar_prefetch = 0 : i64, scratch_operands = 2 : i64, tpu.core_type = #tpu.core_type<tc>} {
    %c0 = arith.constant 0 : index
    %0 = memref.load %arg0[%c0] : memref<8xi32, #tpu.memory_space<smem>>
    %c0_i32 = arith.constant 0 : i32
    %1 = arith.maxsi %0, %c0_i32 : i32
    %c511_i32 = arith.constant 511 : i32
    %2 = arith.minsi %1, %c511_i32 : i32
    %c0_i32_0 = arith.constant 0 : i32
    %c0_i32_1 = arith.constant 0 : i32
    %3 = tpu.memref_slice %arg1[%2, %c0_i32_1] : memref<512x128xf32, #tpu.memory_space<any>> -> memref<1x128xf32, #tpu.memory_space<any>>
    %c0_i32_2 = arith.constant 0 : i32
    %c0_i32_3 = arith.constant 0 : i32
    %4 = tpu.memref_slice %arg5[%c0_i32_2, %c0_i32_3] : memref<8x128xf32, #tpu.memory_space<vmem>> -> memref<1x128xf32, #tpu.memory_space<vmem>>
    %5 = tpu.memref_slice %arg6[%c0_i32_0] : memref<8x!tpu.dma_semaphore, #tpu.memory_space<semaphore_mem>> -> memref<1x!tpu.dma_semaphore, #tpu.memory_space<semaphore_mem>>
    %6 = tpu.memref_squeeze %5 : memref<1x!tpu.dma_semaphore, #tpu.memory_space<semaphore_mem>> -> memref<!tpu.dma_semaphore, #tpu.memory_space<semaphore_mem>>
    tpu.enqueue_dma source(%3 : memref<1x128xf32, #tpu.memory_space<any>>) target(%4 : memref<1x128xf32, #tpu.memory_space<vmem>>) target_semaphore(%6 : memref<!tpu.dma_semaphore, #tpu.memory_space<semaphore_mem>>)
    %c1 = arith.constant 1 : index
    %7 = memref.load %arg0[%c1] : memref<8xi32, #tpu.memory_space<smem>>
    %c0_i32_4 = arith.constant 0 : i32
    %8 = arith.maxsi %7, %c0_i32_4 : i32
    %c511_i32_5 = arith.constant 511 : i32
    %9 = arith.minsi %8, %c511_i32_5 : i32
    %c1_i32 = arith.constant 1 : i32
    %c0_i32_6 = arith.constant 0 : i32
    %10 = tpu.memref_slice %arg1[%9, %c0_i32_6] : memref<512x128xf32, #tpu.memory_space<any>> -> memref<1x128xf32, #tpu.memory_space<any>>
    %c1_i32_7 = arith.constant 1 : i32
    %c0_i32_8 = arith.constant 0 : i32
    %11 = tpu.memref_slice %arg5[%c1_i32_7, %c0_i32_8] : memref<8x128xf32, #tpu.memory_space<vmem>> -> memref<1x128xf32, #tpu.memory_space<vmem>>
    %12 = tpu.memref_slice %arg6[%c1_i32] : memref<8x!tpu.dma_semaphore, #tpu.memory_space<semaphore_mem>> -> memref<1x!tpu.dma_semaphore, #tpu.memory_space<semaphore_mem>>
    %13 = tpu.memref_squeeze %12 : memref<1x!tpu.dma_semaphore, #tpu.memory_space<semaphore_mem>> -> memref<!tpu.dma_semaphore, #tpu.memory_space<semaphore_mem>>
    tpu.enqueue_dma source(%10 : memref<1x128xf32, #tpu.memory_space<any>>) target(%11 : memref<1x128xf32, #tpu.memory_space<vmem>>) target_semaphore(%13 : memref<!tpu.dma_semaphore, #tpu.memory_space<semaphore_mem>>)
    %c2 = arith.constant 2 : index
    %14 = memref.load %arg0[%c2] : memref<8xi32, #tpu.memory_space<smem>>
    %c0_i32_9 = arith.constant 0 : i32
    %15 = arith.maxsi %14, %c0_i32_9 : i32
    %c511_i32_10 = arith.constant 511 : i32
    %16 = arith.minsi %15, %c511_i32_10 : i32
    %c2_i32 = arith.constant 2 : i32
    %c0_i32_11 = arith.constant 0 : i32
    %17 = tpu.memref_slice %arg1[%16, %c0_i32_11] : memref<512x128xf32, #tpu.memory_space<any>> -> memref<1x128xf32, #tpu.memory_space<any>>
    %c2_i32_12 = arith.constant 2 : i32
    %c0_i32_13 = arith.constant 0 : i32
    %18 = tpu.memref_slice %arg5[%c2_i32_12, %c0_i32_13] : memref<8x128xf32, #tpu.memory_space<vmem>> -> memref<1x128xf32, #tpu.memory_space<vmem>>
    %19 = tpu.memref_slice %arg6[%c2_i32] : memref<8x!tpu.dma_semaphore, #tpu.memory_space<semaphore_mem>> -> memref<1x!tpu.dma_semaphore, #tpu.memory_space<semaphore_mem>>
    %20 = tpu.memref_squeeze %19 : memref<1x!tpu.dma_semaphore, #tpu.memory_space<semaphore_mem>> -> memref<!tpu.dma_semaphore, #tpu.memory_space<semaphore_mem>>
    tpu.enqueue_dma source(%17 : memref<1x128xf32, #tpu.memory_space<any>>) target(%18 : memref<1x128xf32, #tpu.memory_space<vmem>>) target_semaphore(%20 : memref<!tpu.dma_semaphore, #tpu.memory_space<semaphore_mem>>)
    %c3 = arith.constant 3 : index
    %21 = memref.load %arg0[%c3] : memref<8xi32, #tpu.memory_space<smem>>
    %c0_i32_14 = arith.constant 0 : i32
    %22 = arith.maxsi %21, %c0_i32_14 : i32
    %c511_i32_15 = arith.constant 511 : i32
    %23 = arith.minsi %22, %c511_i32_15 : i32
    %c3_i32 = arith.constant 3 : i32
    %c0_i32_16 = arith.constant 0 : i32
    %24 = tpu.memref_slice %arg1[%23, %c0_i32_16] : memref<512x128xf32, #tpu.memory_space<any>> -> memref<1x128xf32, #tpu.memory_space<any>>
    %c3_i32_17 = arith.constant 3 : i32
    %c0_i32_18 = arith.constant 0 : i32
    %25 = tpu.memref_slice %arg5[%c3_i32_17, %c0_i32_18] : memref<8x128xf32, #tpu.memory_space<vmem>> -> memref<1x128xf32, #tpu.memory_space<vmem>>
    %26 = tpu.memref_slice %arg6[%c3_i32] : memref<8x!tpu.dma_semaphore, #tpu.memory_space<semaphore_mem>> -> memref<1x!tpu.dma_semaphore, #tpu.memory_space<semaphore_mem>>
    %27 = tpu.memref_squeeze %26 : memref<1x!tpu.dma_semaphore, #tpu.memory_space<semaphore_mem>> -> memref<!tpu.dma_semaphore, #tpu.memory_space<semaphore_mem>>
    tpu.enqueue_dma source(%24 : memref<1x128xf32, #tpu.memory_space<any>>) target(%25 : memref<1x128xf32, #tpu.memory_space<vmem>>) target_semaphore(%27 : memref<!tpu.dma_semaphore, #tpu.memory_space<semaphore_mem>>)
    %c4 = arith.constant 4 : index
    %28 = memref.load %arg0[%c4] : memref<8xi32, #tpu.memory_space<smem>>
    %c0_i32_19 = arith.constant 0 : i32
    %29 = arith.maxsi %28, %c0_i32_19 : i32
    %c511_i32_20 = arith.constant 511 : i32
    %30 = arith.minsi %29, %c511_i32_20 : i32
    %c4_i32 = arith.constant 4 : i32
    %c0_i32_21 = arith.constant 0 : i32
    %31 = tpu.memref_slice %arg1[%30, %c0_i32_21] : memref<512x128xf32, #tpu.memory_space<any>> -> memref<1x128xf32, #tpu.memory_space<any>>
    %c4_i32_22 = arith.constant 4 : i32
    %c0_i32_23 = arith.constant 0 : i32
    %32 = tpu.memref_slice %arg5[%c4_i32_22, %c0_i32_23] : memref<8x128xf32, #tpu.memory_space<vmem>> -> memref<1x128xf32, #tpu.memory_space<vmem>>
    %33 = tpu.memref_slice %arg6[%c4_i32] : memref<8x!tpu.dma_semaphore, #tpu.memory_space<semaphore_mem>> -> memref<1x!tpu.dma_semaphore, #tpu.memory_space<semaphore_mem>>
    %34 = tpu.memref_squeeze %33 : memref<1x!tpu.dma_semaphore, #tpu.memory_space<semaphore_mem>> -> memref<!tpu.dma_semaphore, #tpu.memory_space<semaphore_mem>>
    tpu.enqueue_dma source(%31 : memref<1x128xf32, #tpu.memory_space<any>>) target(%32 : memref<1x128xf32, #tpu.memory_space<vmem>>) target_semaphore(%34 : memref<!tpu.dma_semaphore, #tpu.memory_space<semaphore_mem>>)
    %c5 = arith.constant 5 : index
    %35 = memref.load %arg0[%c5] : memref<8xi32, #tpu.memory_space<smem>>
    %c0_i32_24 = arith.constant 0 : i32
    %36 = arith.maxsi %35, %c0_i32_24 : i32
    %c511_i32_25 = arith.constant 511 : i32
    %37 = arith.minsi %36, %c511_i32_25 : i32
    %c5_i32 = arith.constant 5 : i32
    %c0_i32_26 = arith.constant 0 : i32
    %38 = tpu.memref_slice %arg1[%37, %c0_i32_26] : memref<512x128xf32, #tpu.memory_space<any>> -> memref<1x128xf32, #tpu.memory_space<any>>
    %c5_i32_27 = arith.constant 5 : i32
    %c0_i32_28 = arith.constant 0 : i32
    %39 = tpu.memref_slice %arg5[%c5_i32_27, %c0_i32_28] : memref<8x128xf32, #tpu.memory_space<vmem>> -> memref<1x128xf32, #tpu.memory_space<vmem>>
    %40 = tpu.memref_slice %arg6[%c5_i32] : memref<8x!tpu.dma_semaphore, #tpu.memory_space<semaphore_mem>> -> memref<1x!tpu.dma_semaphore, #tpu.memory_space<semaphore_mem>>
    %41 = tpu.memref_squeeze %40 : memref<1x!tpu.dma_semaphore, #tpu.memory_space<semaphore_mem>> -> memref<!tpu.dma_semaphore, #tpu.memory_space<semaphore_mem>>
    tpu.enqueue_dma source(%38 : memref<1x128xf32, #tpu.memory_space<any>>) target(%39 : memref<1x128xf32, #tpu.memory_space<vmem>>) target_semaphore(%41 : memref<!tpu.dma_semaphore, #tpu.memory_space<semaphore_mem>>)
    %c6 = arith.constant 6 : index
    %42 = memref.load %arg0[%c6] : memref<8xi32, #tpu.memory_space<smem>>
    %c0_i32_29 = arith.constant 0 : i32
    %43 = arith.maxsi %42, %c0_i32_29 : i32
    %c511_i32_30 = arith.constant 511 : i32
    %44 = arith.minsi %43, %c511_i32_30 : i32
    %c6_i32 = arith.constant 6 : i32
    %c0_i32_31 = arith.constant 0 : i32
    %45 = tpu.memref_slice %arg1[%44, %c0_i32_31] : memref<512x128xf32, #tpu.memory_space<any>> -> memref<1x128xf32, #tpu.memory_space<any>>
    %c6_i32_32 = arith.constant 6 : i32
    %c0_i32_33 = arith.constant 0 : i32
    %46 = tpu.memref_slice %arg5[%c6_i32_32, %c0_i32_33] : memref<8x128xf32, #tpu.memory_space<vmem>> -> memref<1x128xf32, #tpu.memory_space<vmem>>
    %47 = tpu.memref_slice %arg6[%c6_i32] : memref<8x!tpu.dma_semaphore, #tpu.memory_space<semaphore_mem>> -> memref<1x!tpu.dma_semaphore, #tpu.memory_space<semaphore_mem>>
    %48 = tpu.memref_squeeze %47 : memref<1x!tpu.dma_semaphore, #tpu.memory_space<semaphore_mem>> -> memref<!tpu.dma_semaphore, #tpu.memory_space<semaphore_mem>>
    tpu.enqueue_dma source(%45 : memref<1x128xf32, #tpu.memory_space<any>>) target(%46 : memref<1x128xf32, #tpu.memory_space<vmem>>) target_semaphore(%48 : memref<!tpu.dma_semaphore, #tpu.memory_space<semaphore_mem>>)
    %c7 = arith.constant 7 : index
    %49 = memref.load %arg0[%c7] : memref<8xi32, #tpu.memory_space<smem>>
    %c0_i32_34 = arith.constant 0 : i32
    %50 = arith.maxsi %49, %c0_i32_34 : i32
    %c511_i32_35 = arith.constant 511 : i32
    %51 = arith.minsi %50, %c511_i32_35 : i32
    %c7_i32 = arith.constant 7 : i32
    %c0_i32_36 = arith.constant 0 : i32
    %52 = tpu.memref_slice %arg1[%51, %c0_i32_36] : memref<512x128xf32, #tpu.memory_space<any>> -> memref<1x128xf32, #tpu.memory_space<any>>
    %c7_i32_37 = arith.constant 7 : i32
    %c0_i32_38 = arith.constant 0 : i32
    %53 = tpu.memref_slice %arg5[%c7_i32_37, %c0_i32_38] : memref<8x128xf32, #tpu.memory_space<vmem>> -> memref<1x128xf32, #tpu.memory_space<vmem>>
    %54 = tpu.memref_slice %arg6[%c7_i32] : memref<8x!tpu.dma_semaphore, #tpu.memory_space<semaphore_mem>> -> memref<1x!tpu.dma_semaphore, #tpu.memory_space<semaphore_mem>>
    %55 = tpu.memref_squeeze %54 : memref<1x!tpu.dma_semaphore, #tpu.memory_space<semaphore_mem>> -> memref<!tpu.dma_semaphore, #tpu.memory_space<semaphore_mem>>
    tpu.enqueue_dma source(%52 : memref<1x128xf32, #tpu.memory_space<any>>) target(%53 : memref<1x128xf32, #tpu.memory_space<vmem>>) target_semaphore(%55 : memref<!tpu.dma_semaphore, #tpu.memory_space<semaphore_mem>>)
    %c0_i32_39 = arith.constant 0 : i32
    %c0_i32_40 = arith.constant 0 : i32
    %c0_i32_41 = arith.constant 0 : i32
    %56 = tpu.memref_slice %arg1[%c0_i32_40, %c0_i32_41] : memref<512x128xf32, #tpu.memory_space<any>> -> memref<1x128xf32, #tpu.memory_space<any>>
    %c0_i32_42 = arith.constant 0 : i32
    %c0_i32_43 = arith.constant 0 : i32
    %57 = tpu.memref_slice %arg5[%c0_i32_42, %c0_i32_43] : memref<8x128xf32, #tpu.memory_space<vmem>> -> memref<1x128xf32, #tpu.memory_space<vmem>>
    %58 = tpu.memref_slice %arg6[%c0_i32_39] : memref<8x!tpu.dma_semaphore, #tpu.memory_space<semaphore_mem>> -> memref<1x!tpu.dma_semaphore, #tpu.memory_space<semaphore_mem>>
    %59 = tpu.memref_squeeze %58 : memref<1x!tpu.dma_semaphore, #tpu.memory_space<semaphore_mem>> -> memref<!tpu.dma_semaphore, #tpu.memory_space<semaphore_mem>>
    tpu.wait_dma2 semaphore(%59 : memref<!tpu.dma_semaphore, #tpu.memory_space<semaphore_mem>>) src(%56 : memref<1x128xf32, #tpu.memory_space<any>>) dst(%57 : memref<1x128xf32, #tpu.memory_space<vmem>>)
    %c1_i32_44 = arith.constant 1 : i32
    %c0_i32_45 = arith.constant 0 : i32
    %c0_i32_46 = arith.constant 0 : i32
    %60 = tpu.memref_slice %arg1[%c0_i32_45, %c0_i32_46] : memref<512x128xf32, #tpu.memory_space<any>> -> memref<1x128xf32, #tpu.memory_space<any>>
    %c1_i32_47 = arith.constant 1 : i32
    %c0_i32_48 = arith.constant 0 : i32
    %61 = tpu.memref_slice %arg5[%c1_i32_47, %c0_i32_48] : memref<8x128xf32, #tpu.memory_space<vmem>> -> memref<1x128xf32, #tpu.memory_space<vmem>>
    %62 = tpu.memref_slice %arg6[%c1_i32_44] : memref<8x!tpu.dma_semaphore, #tpu.memory_space<semaphore_mem>> -> memref<1x!tpu.dma_semaphore, #tpu.memory_space<semaphore_mem>>
    %63 = tpu.memref_squeeze %62 : memref<1x!tpu.dma_semaphore, #tpu.memory_space<semaphore_mem>> -> memref<!tpu.dma_semaphore, #tpu.memory_space<semaphore_mem>>
    tpu.wait_dma2 semaphore(%63 : memref<!tpu.dma_semaphore, #tpu.memory_space<semaphore_mem>>) src(%60 : memref<1x128xf32, #tpu.memory_space<any>>) dst(%61 : memref<1x128xf32, #tpu.memory_space<vmem>>)
    %c2_i32_49 = arith.constant 2 : i32
    %c0_i32_50 = arith.constant 0 : i32
    %c0_i32_51 = arith.constant 0 : i32
    %64 = tpu.memref_slice %arg1[%c0_i32_50, %c0_i32_51] : memref<512x128xf32, #tpu.memory_space<any>> -> memref<1x128xf32, #tpu.memory_space<any>>
    %c2_i32_52 = arith.constant 2 : i32
    %c0_i32_53 = arith.constant 0 : i32
    %65 = tpu.memref_slice %arg5[%c2_i32_52, %c0_i32_53] : memref<8x128xf32, #tpu.memory_space<vmem>> -> memref<1x128xf32, #tpu.memory_space<vmem>>
    %66 = tpu.memref_slice %arg6[%c2_i32_49] : memref<8x!tpu.dma_semaphore, #tpu.memory_space<semaphore_mem>> -> memref<1x!tpu.dma_semaphore, #tpu.memory_space<semaphore_mem>>
    %67 = tpu.memref_squeeze %66 : memref<1x!tpu.dma_semaphore, #tpu.memory_space<semaphore_mem>> -> memref<!tpu.dma_semaphore, #tpu.memory_space<semaphore_mem>>
    tpu.wait_dma2 semaphore(%67 : memref<!tpu.dma_semaphore, #tpu.memory_space<semaphore_mem>>) src(%64 : memref<1x128xf32, #tpu.memory_space<any>>) dst(%65 : memref<1x128xf32, #tpu.memory_space<vmem>>)
    %c3_i32_54 = arith.constant 3 : i32
    %c0_i32_55 = arith.constant 0 : i32
    %c0_i32_56 = arith.constant 0 : i32
    %68 = tpu.memref_slice %arg1[%c0_i32_55, %c0_i32_56] : memref<512x128xf32, #tpu.memory_space<any>> -> memref<1x128xf32, #tpu.memory_space<any>>
    %c3_i32_57 = arith.constant 3 : i32
    %c0_i32_58 = arith.constant 0 : i32
    %69 = tpu.memref_slice %arg5[%c3_i32_57, %c0_i32_58] : memref<8x128xf32, #tpu.memory_space<vmem>> -> memref<1x128xf32, #tpu.memory_space<vmem>>
    %70 = tpu.memref_slice %arg6[%c3_i32_54] : memref<8x!tpu.dma_semaphore, #tpu.memory_space<semaphore_mem>> -> memref<1x!tpu.dma_semaphore, #tpu.memory_space<semaphore_mem>>
    %71 = tpu.memref_squeeze %70 : memref<1x!tpu.dma_semaphore, #tpu.memory_space<semaphore_mem>> -> memref<!tpu.dma_semaphore, #tpu.memory_space<semaphore_mem>>
    tpu.wait_dma2 semaphore(%71 : memref<!tpu.dma_semaphore, #tpu.memory_space<semaphore_mem>>) src(%68 : memref<1x128xf32, #tpu.memory_space<any>>) dst(%69 : memref<1x128xf32, #tpu.memory_space<vmem>>)
    %c4_i32_59 = arith.constant 4 : i32
    %c0_i32_60 = arith.constant 0 : i32
    %c0_i32_61 = arith.constant 0 : i32
    %72 = tpu.memref_slice %arg1[%c0_i32_60, %c0_i32_61] : memref<512x128xf32, #tpu.memory_space<any>> -> memref<1x128xf32, #tpu.memory_space<any>>
    %c4_i32_62 = arith.constant 4 : i32
    %c0_i32_63 = arith.constant 0 : i32
    %73 = tpu.memref_slice %arg5[%c4_i32_62, %c0_i32_63] : memref<8x128xf32, #tpu.memory_space<vmem>> -> memref<1x128xf32, #tpu.memory_space<vmem>>
    %74 = tpu.memref_slice %arg6[%c4_i32_59] : memref<8x!tpu.dma_semaphore, #tpu.memory_space<semaphore_mem>> -> memref<1x!tpu.dma_semaphore, #tpu.memory_space<semaphore_mem>>
    %75 = tpu.memref_squeeze %74 : memref<1x!tpu.dma_semaphore, #tpu.memory_space<semaphore_mem>> -> memref<!tpu.dma_semaphore, #tpu.memory_space<semaphore_mem>>
    tpu.wait_dma2 semaphore(%75 : memref<!tpu.dma_semaphore, #tpu.memory_space<semaphore_mem>>) src(%72 : memref<1x128xf32, #tpu.memory_space<any>>) dst(%73 : memref<1x128xf32, #tpu.memory_space<vmem>>)
    %c5_i32_64 = arith.constant 5 : i32
    %c0_i32_65 = arith.constant 0 : i32
    %c0_i32_66 = arith.constant 0 : i32
    %76 = tpu.memref_slice %arg1[%c0_i32_65, %c0_i32_66] : memref<512x128xf32, #tpu.memory_space<any>> -> memref<1x128xf32, #tpu.memory_space<any>>
    %c5_i32_67 = arith.constant 5 : i32
    %c0_i32_68 = arith.constant 0 : i32
    %77 = tpu.memref_slice %arg5[%c5_i32_67, %c0_i32_68] : memref<8x128xf32, #tpu.memory_space<vmem>> -> memref<1x128xf32, #tpu.memory_space<vmem>>
    %78 = tpu.memref_slice %arg6[%c5_i32_64] : memref<8x!tpu.dma_semaphore, #tpu.memory_space<semaphore_mem>> -> memref<1x!tpu.dma_semaphore, #tpu.memory_space<semaphore_mem>>
    %79 = tpu.memref_squeeze %78 : memref<1x!tpu.dma_semaphore, #tpu.memory_space<semaphore_mem>> -> memref<!tpu.dma_semaphore, #tpu.memory_space<semaphore_mem>>
    tpu.wait_dma2 semaphore(%79 : memref<!tpu.dma_semaphore, #tpu.memory_space<semaphore_mem>>) src(%76 : memref<1x128xf32, #tpu.memory_space<any>>) dst(%77 : memref<1x128xf32, #tpu.memory_space<vmem>>)
    %c6_i32_69 = arith.constant 6 : i32
    %c0_i32_70 = arith.constant 0 : i32
    %c0_i32_71 = arith.constant 0 : i32
    %80 = tpu.memref_slice %arg1[%c0_i32_70, %c0_i32_71] : memref<512x128xf32, #tpu.memory_space<any>> -> memref<1x128xf32, #tpu.memory_space<any>>
    %c6_i32_72 = arith.constant 6 : i32
    %c0_i32_73 = arith.constant 0 : i32
    %81 = tpu.memref_slice %arg5[%c6_i32_72, %c0_i32_73] : memref<8x128xf32, #tpu.memory_space<vmem>> -> memref<1x128xf32, #tpu.memory_space<vmem>>
    %82 = tpu.memref_slice %arg6[%c6_i32_69] : memref<8x!tpu.dma_semaphore, #tpu.memory_space<semaphore_mem>> -> memref<1x!tpu.dma_semaphore, #tpu.memory_space<semaphore_mem>>
    %83 = tpu.memref_squeeze %82 : memref<1x!tpu.dma_semaphore, #tpu.memory_space<semaphore_mem>> -> memref<!tpu.dma_semaphore, #tpu.memory_space<semaphore_mem>>
    tpu.wait_dma2 semaphore(%83 : memref<!tpu.dma_semaphore, #tpu.memory_space<semaphore_mem>>) src(%80 : memref<1x128xf32, #tpu.memory_space<any>>) dst(%81 : memref<1x128xf32, #tpu.memory_space<vmem>>)
    %c7_i32_74 = arith.constant 7 : i32
    %c0_i32_75 = arith.constant 0 : i32
    %c0_i32_76 = arith.constant 0 : i32
    %84 = tpu.memref_slice %arg1[%c0_i32_75, %c0_i32_76] : memref<512x128xf32, #tpu.memory_space<any>> -> memref<1x128xf32, #tpu.memory_space<any>>
    %c7_i32_77 = arith.constant 7 : i32
    %c0_i32_78 = arith.constant 0 : i32
    %85 = tpu.memref_slice %arg5[%c7_i32_77, %c0_i32_78] : memref<8x128xf32, #tpu.memory_space<vmem>> -> memref<1x128xf32, #tpu.memory_space<vmem>>
    %86 = tpu.memref_slice %arg6[%c7_i32_74] : memref<8x!tpu.dma_semaphore, #tpu.memory_space<semaphore_mem>> -> memref<1x!tpu.dma_semaphore, #tpu.memory_space<semaphore_mem>>
    %87 = tpu.memref_squeeze %86 : memref<1x!tpu.dma_semaphore, #tpu.memory_space<semaphore_mem>> -> memref<!tpu.dma_semaphore, #tpu.memory_space<semaphore_mem>>
    tpu.wait_dma2 semaphore(%87 : memref<!tpu.dma_semaphore, #tpu.memory_space<semaphore_mem>>) src(%84 : memref<1x128xf32, #tpu.memory_space<any>>) dst(%85 : memref<1x128xf32, #tpu.memory_space<vmem>>)
    %c0_79 = arith.constant 0 : index
    %c0_80 = arith.constant 0 : index
    %88 = vector.load %arg5[%c0_79, %c0_80] : memref<8x128xf32, #tpu.memory_space<vmem>>, vector<8x128xf32>
    %c0_81 = arith.constant 0 : index
    %c0_82 = arith.constant 0 : index
    %c0_83 = arith.constant 0 : index
    %89 = vector.load %arg2[%c0_81, %c0_82, %c0_83] : memref<2x128x128xf32, #tpu.memory_space<vmem>>, vector<1x128x128xf32>
    %90 = vector.shape_cast %89 : vector<1x128x128xf32> to vector<128x128xf32>
    %c1_84 = arith.constant 1 : index
    %c0_85 = arith.constant 0 : index
    %c0_86 = arith.constant 0 : index
    %91 = vector.load %arg2[%c1_84, %c0_85, %c0_86] : memref<2x128x128xf32, #tpu.memory_space<vmem>>, vector<1x128x128xf32>
    %92 = vector.shape_cast %91 : vector<1x128x128xf32> to vector<128x128xf32>
    %cst = arith.constant dense<0.000000e+00> : vector<8x128xf32>
    %93 = tpu.matmul %88, %90, %cst {dimension_numbers = #tpu.dot_dimension_numbers<[1], [0], [0], [1], [0, 0, 1, 1], [], []>} : vector<8x128xf32>, vector<128x128xf32>, vector<8x128xf32> -> vector<8x128xf32>
    %c0_87 = arith.constant 0 : index
    %c0_88 = arith.constant 0 : index
    %94 = vector.load %arg3[%c0_87, %c0_88] : memref<2x128xf32, #tpu.memory_space<vmem>>, vector<1x128xf32>
    %95 = vector.broadcast %94 : vector<1x128xf32> to vector<8x128xf32>
    %96 = arith.addf %93, %95 : vector<8x128xf32>
    %97 = arith.negf %96 : vector<8x128xf32>
    %98 = math.exp %97 : vector<8x128xf32>
    %cst_89 = arith.constant 1.000000e+00 : f32
    %99 = vector.broadcast %cst_89 : f32 to vector<8x128xf32>
    %100 = arith.addf %99, %98 : vector<8x128xf32>
    %101 = arith.divf %99, %100 : vector<8x128xf32>
    %102 = arith.mulf %96, %101 : vector<8x128xf32>
    %cst_90 = arith.constant dense<0.000000e+00> : vector<8x128xf32>
    %103 = tpu.matmul %102, %92, %cst_90 {dimension_numbers = #tpu.dot_dimension_numbers<[1], [0], [0], [1], [0, 0, 1, 1], [], []>} : vector<8x128xf32>, vector<128x128xf32>, vector<8x128xf32> -> vector<8x128xf32>
    %c1_91 = arith.constant 1 : index
    %c0_92 = arith.constant 0 : index
    %104 = vector.load %arg3[%c1_91, %c0_92] : memref<2x128xf32, #tpu.memory_space<vmem>>, vector<1x128xf32>
    %105 = vector.broadcast %104 : vector<1x128xf32> to vector<8x128xf32>
    %106 = arith.addf %103, %105 : vector<8x128xf32>
    %c0_93 = arith.constant 0 : index
    %c0_94 = arith.constant 0 : index
    %107 = vector.load %arg4[%c0_93, %c0_94] : memref<8x128xf32, #tpu.memory_space<vmem>>, vector<8x128xf32>
    tpu.vector_store %arg4[%c0_93, %c0_94], %106 {strides = array<i32>} : memref<8x128xf32, #tpu.memory_space<vmem>>, vector<8x128xf32>,
    return
  }
}

</mosaic_0001>

<bundles_post_ra>
// kernel: tpu_custom_call.1
= control target key start
LH: loop header
LB: loop body
LE: loop exit
PB: predicated region body
PF: predicated region fallthrough
CT: control target
= control target key end

     0   :  { %9 = vsyncpa [#allocation7], 0  ;;  %s1257_s0 = inlined_call_operand.hbm [shape: s32[8], index: 0, kind: input, shape index: {}]   ;;  %s1258_s1 = inlined_call_operand.hbm [shape: f32[512,128], index: 1, kind: input, shape index: {}]   ;;  %s1259_s2 = inlined_call_operand.hbm [shape: f32[2,128,128], index: 2, kind: input, shape index: {}]   ;;  %s1260_s3 = inlined_call_operand.vmem [shape: f32[2,128], index: 3, kind: input, shape index: {}]   ;;  %s1261_s4 = inlined_call_operand.hbm [shape: f32[8,128], index: 4, kind: output, shape index: {}]  }
   0x1   :  { %10 = vsyncpa [#allocation5], 0 }
   0x2   :  { %11 = vsyncpa [#allocation6], 0  ;;  %s749_s17 = scalar_lea.hbm %s1257_s0, 16 }
   0x3   :  { %p750_p0 = scmp.ne.s32.totalorder %s1257_s0, %s749_s17  ;;  %p753_p1 = scmp.lt.u32.totalorder %s749_s17, %s1257_s0 }
   0x5   :  { %p755_p2 = pnand %p753_p1, %p750_p0 }
   0x7   :  { %758 = shalt.err (!%p755_p2)
}
   0x8   :  { %s1017_s22 = smov [#allocation4]   ;;  %s1018_s25 = smov [#allocation8]  }
   0x9   :  { %19 = dma.hbm_to_smem %s1257_s0, 16, %s1017_s22, [#allocation7]  }
   0xa   :  { %s25_s26 = sshll.u32 %s1018_s25, 4  ;;  %s759_s29 = scalar_lea.hbm %s1259_s2, 4096  ;;  %s26_s26 = int_to_ptr.vmem [resolvable:$true] %s25_s26 }
   0xb   :  { %p760_p3 = scmp.ne.s32.totalorder %s1259_s2, %s759_s29  ;;  %p763_p4 = scmp.lt.u32.totalorder %s759_s29, %s1259_s2 }
   0xd   :  { %p765_p5 = pnand %p763_p4, %p760_p3 }
   0xf   :  { %768 = shalt.err (!%p765_p5)
}
  0x10   :  { %s769_s8 = scalar_lea.vmem %s26_s26, 4096  ;;  %p774_p7 = scmp.lt.s32.totalorder %s26_s26, %s26_s26 }
  0x11   :  { %p770_p6 = scmp.ne.s32.totalorder %s26_s26, %s769_s8  ;;  %p775_p8 = scmp.lt.s32.totalorder %s769_s8, %s769_s8 }
  0x13   :  { %p776_p9 = por %p775_p8, %p774_p7 }
  0x15   :  { %p777_p10 = pnand %p776_p9, %p770_p6 }
  0x17   :  { %780 = shalt.err (!%p777_p10)
}
  0x18   :  { %s1019_s0 = smov 128   ;;  %s1020_s9 = smov 8  }
  0x19   :  { %31 = dma.hbm_to_vmem [thread:$0]  %s1259_s2, 4096, %s26_s26, [#allocation5], %s1019_s0, %s1019_s0, %s1020_s9  }
  0x1a   :  { %995 = dma.done.wait [#allocation7], 16  }
  0x1b   :  { %996 = vsyncadd [#allocation7], 4294967280 }
  0x1c   :  { %997 = dma.done.wait [#allocation5], 4096  }
  0x1d   :  { %998 = vsyncadd [#allocation5], 4294963200 }
  0x1e   :  { %40 = sfence }
  0x1f   :  { %s41_s12 = sld [smem:[#allocation4]]  ;;  %s1021_s13 = smov [#allocation2]  }
  0x20   :  { %s55_s14 = sshll.u32 %s1021_s13, 4  ;;  %s501_s15 = sld [smem:[#allocation4 + $0x1]]  ;;  %s1082_s14 = int_to_ptr.vmem [resolvable:$true] %s55_s14 }
  0x21   :  { %s1022_s16 = smov [#allocation2 + $0x1]   ;;  %s1084_s18 = sld [smem:[#allocation4 + $0x2]] }
  0x22   :  { %s75_s17 = sshll.u32 %s1022_s16, 4  ;;  %s1023_s19 = smov [#allocation2 + $0x2]   ;;  %s1086_s17 = int_to_ptr.vmem [resolvable:$true] %s75_s17 }
  0x23   :  { %s1088_s2 = sshll.u32 %s1023_s19, 4  ;;  %s1090_s20 = sld [smem:[#allocation4 + $0x3]]  ;;  %s96_s2 = int_to_ptr.vmem [resolvable:$true] %s1088_s2 }
  0x24   :  { %s1099_s29 = scalar_lea.hbm %s1258_s1, 8192 }
  0x25   :  { %p42_p11 = scmp.gt.s32.totalorder %s41_s12, 0  ;;  %p495_p12 = scmp.lt.s32.totalorder %s41_s12, 511 }
  0x26   :  { %p60_p13 = scmp.gt.s32.totalorder %s501_s15, 0  ;;  %p502_p0 = scmp.lt.s32.totalorder %s501_s15, 511 }
  0x27   :  { %s1264_s12 = smov (!%p42_p11, %s41_s12), 0  ;;  %p80_p1 = scmp.gt.s32.totalorder %s1084_s18, 0 }
  0x28   :  { %s1266_s15 = smov (!%p60_p13, %s501_s15), 0  ;;  %s1268_s12 = smov (!%p495_p12, %s1264_s12), 511 }
  0x29   :  { %s1270_s15 = smov (!%p502_p0, %s1266_s15), 511  ;;  %s500_s21 = sshll.u32 %s1268_s12, 4 }
  0x2a   :  { %s47_s24 = scalar_lea.hbm %s1258_s1, %s500_s21  ;;  %s507_s25 = sshll.u32 %s1270_s15, 4 }
  0x2b   :  { %s781_s26 = scalar_lea.hbm %s47_s24, 16  ;;  %p784_p3 = scmp.lt.u32.totalorder %s47_s24, %s1258_s1 }
  0x2c   :  { %p782_p2 = scmp.ne.s32.totalorder %s47_s24, %s781_s26  ;;  %p785_p4 = scmp.lt.u32.totalorder %s1099_s29, %s781_s26 }
  0x2d   :  { %p787_p6 = scmp.lt.u32.totalorder %s781_s26, %s47_s24 }
  0x2e   :  { %p786_p5 = por %p785_p4, %p784_p3 }
  0x30   :  { %p788_p7 = por %p787_p6, %p786_p5 }
  0x32   :  { %p789_p8 = pnand %p788_p7, %p782_p2 }
  0x34   :  { %792 = shalt.err (!%p789_p8)  }
  0x35   :  { %s793_s6 = scalar_lea.vmem %s1082_s14, 16  ;;  %s1108_s7 = scalar_lea.vmem %s1082_s14, 128 }
  0x36   :  { %p794_p9 = scmp.ne.s32.totalorder %s1082_s14, %s793_s6  ;;  %p798_p10 = scmp.lt.s32.totalorder %s1082_s14, %s1082_s14 }
  0x37   :  { %p799_p11 = scmp.lt.s32.totalorder %s1108_s7, %s793_s6 }
  0x39   :  { %p800_p12 = por %p799_p11, %p798_p10 }
  0x3b   :  { %p801_p13 = pnand %p800_p12, %p794_p9 }
  0x3d   :  { %804 = shalt.err (!%p801_p13)  }
  0x3e   :  { %58 = dma.hbm_to_vmem [thread:$0]  %s47_s24, 16, %s1082_s14, [#allocation3] }
  0x3f   :  { %s65_s9 = scalar_lea.hbm %s1258_s1, %s507_s25  ;;  %p509_p0 = scmp.lt.s32.totalorder %s1084_s18, 511 }
  0x40   :  { %s805_s10 = scalar_lea.hbm %s65_s9, 16  ;;  %p808_p3 = scmp.lt.u32.totalorder %s65_s9, %s1258_s1 }
  0x41   :  { %p806_p2 = scmp.ne.s32.totalorder %s65_s9, %s805_s10  ;;  %p809_p4 = scmp.lt.u32.totalorder %s1099_s29, %s805_s10 }
  0x42   :  { %p811_p6 = scmp.lt.u32.totalorder %s805_s10, %s65_s9 }
  0x43   :  { %p810_p5 = por %p809_p4, %p808_p3 }
  0x45   :  { %p812_p7 = por %p811_p6, %p810_p5 }
  0x47   :  { %p813_p8 = pnand %p812_p7, %p806_p2 }
  0x49   :  { %816 = shalt.err (!%p813_p8)  }
  0x4a   :  { %s817_s13 = scalar_lea.vmem %s1086_s17, 16  ;;  %p822_p10 = scmp.lt.s32.totalorder %s1086_s17, %s1082_s14 }
  0x4b   :  { %p818_p9 = scmp.ne.s32.totalorder %s1086_s17, %s817_s13  ;;  %p823_p11 = scmp.lt.s32.totalorder %s1108_s7, %s817_s13 }
  0x4d   :  { %p824_p12 = por %p823_p11, %p822_p10 }
  0x4f   :  { %p825_p13 = pnand %p824_p12, %p818_p9 }
  0x51   :  { %828 = shalt.err (!%p825_p13)  }
  0x52   :  { %78 = dma.hbm_to_vmem [thread:$0]  %s65_s9, 16, %s1086_s17, [#allocation3 + $0x1] }
  0x53   :  { %s81_s15 = scalar_select %p80_p1, %s1084_s18, 0 }
  0x54   :  { %p100_p2 = scmp.gt.s32.totalorder %s1090_s20, 0  ;;  %p516_p3 = scmp.lt.s32.totalorder %s1090_s20, 511 }
  0x55   :  { %s1272_s15 = smov (!%p509_p0, %s81_s15), 511 }
  0x56   :  { %s101_s16 = scalar_select %p100_p2, %s1090_s20, 0 }
  0x57   :  { %s514_s19 = sshll.u32 %s1272_s15, 4 }
  0x58   :  { %s85_s23 = scalar_lea.hbm %s1258_s1, %s514_s19 }
  0x59   :  { %s829_s24 = scalar_lea.hbm %s85_s23, 16  ;;  %p832_p5 = scmp.lt.u32.totalorder %s85_s23, %s1258_s1 }
  0x5a   :  { %p830_p4 = scmp.ne.s32.totalorder %s85_s23, %s829_s24  ;;  %p833_p6 = scmp.lt.u32.totalorder %s1099_s29, %s829_s24 }
  0x5b   :  { %p835_p1 = scmp.lt.u32.totalorder %s829_s24, %s85_s23 }
  0x5c   :  { %p834_p7 = por %p833_p6, %p832_p5 }
  0x5e   :  { %p836_p8 = por %p835_p1, %p834_p7 }
  0x60   :  { %p837_p9 = pnand %p836_p8, %p830_p4 }
  0x62   :  { %840 = shalt.err (!%p837_p9)  }
  0x63   :  { %s841_s17 = scalar_lea.vmem %s96_s2, 16  ;;  %p846_p10 = scmp.lt.s32.totalorder %s96_s2, %s1082_s14 }
  0x64   :  { %p842_p0 = scmp.ne.s32.totalorder %s96_s2, %s841_s17  ;;  %p847_p11 = scmp.lt.s32.totalorder %s1108_s7, %s841_s17 }
  0x66   :  { %p848_p12 = por %p847_p11, %p846_p10 }
  0x68   :  { %p849_p13 = pnand %p848_p12, %p842_p0 }
  0x6a   :  { %852 = shalt.err (!%p849_p13)  }
  0x6b   :  { %98 = dma.hbm_to_vmem [thread:$0]  %s85_s23, 16, %s96_s2, [#allocation3 + $0x2] }
  0x6c   :  { %s1274_s16 = smov (!%p516_p3, %s101_s16), 511  ;;  %s1024_s18 = smov [#allocation2 + $0x3]  }
  0x6d   :  { %s115_s27 = sshll.u32 %s1024_s18, 4  ;;  %s1148_s28 = sld [smem:[#allocation4 + $0x4]]  ;;  %s116_s27 = int_to_ptr.vmem [resolvable:$true] %s115_s27 }
  0x6e   :  { %s521_s30 = sshll.u32 %s1274_s16, 4 }
  0x6f   :  { %s105_s8 = scalar_lea.hbm %s1258_s1, %s521_s30 }
  0x70   :  { %s853_s0 = scalar_lea.hbm %s105_s8, 16  ;;  %p856_p4 = scmp.lt.u32.totalorder %s105_s8, %s1258_s1 }
  0x71   :  { %p854_p2 = scmp.ne.s32.totalorder %s105_s8, %s853_s0  ;;  %p857_p5 = scmp.lt.u32.totalorder %s1099_s29, %s853_s0 }
  0x72   :  { %p859_p7 = scmp.lt.u32.totalorder %s853_s0, %s105_s8 }
  0x73   :  { %p858_p6 = por %p857_p5, %p856_p4 }
  0x75   :  { %p860_p3 = por %p859_p7, %p858_p6 }
  0x77   :  { %p861_p1 = pnand %p860_p3, %p854_p2 }
  0x79   :  { %864 = shalt.err (!%p861_p1)  }
  0x7a   :  { %s865_s2 = scalar_lea.vmem %s116_s27, 16  ;;  %p870_p9 = scmp.lt.s32.totalorder %s116_s27, %s1082_s14 }
  0x7b   :  { %p866_p8 = scmp.ne.s32.totalorder %s116_s27, %s865_s2  ;;  %p871_p0 = scmp.lt.s32.totalorder %s1108_s7, %s865_s2 }
  0x7d   :  { %p872_p10 = por %p871_p0, %p870_p9 }
  0x7f   :  { %p873_p11 = pnand %p872_p10, %p866_p8 }
  0x81   :  { %876 = shalt.err (!%p873_p11)  }
  0x82   :  { %118 = dma.hbm_to_vmem [thread:$0]  %s105_s8, 16, %s116_s27, [#allocation3 + $0x3] }
  0x83   :  { %s1159_s20 = sld [smem:[#allocation4 + $0x5]]  ;;  %s1025_s11 = smov [#allocation2 + $0x4]  }
  0x84   :  { %s135_s12 = sshll.u32 %s1025_s11, 4  ;;  %p120_p12 = scmp.gt.s32.totalorder %s1148_s28, 0  ;;  %s136_s12 = int_to_ptr.vmem [resolvable:$true] %s135_s12 }
  0x85   :  { %p523_p13 = scmp.lt.s32.totalorder %s1148_s28, 511  ;;  %s1163_s13 = sld [smem:[#allocation4 + $0x6]] }
  0x86   :  { %s1276_s28 = smov (!%p120_p12, %s1148_s28), 0  ;;  %s1026_s15 = smov [#allocation2 + $0x5]  }
  0x87   :  { %s155_s16 = sshll.u32 %s1026_s15, 4  ;;  %s1278_s28 = smov (!%p523_p13, %s1276_s28), 511  ;;  %s156_s16 = int_to_ptr.vmem [resolvable:$true] %s155_s16 }
  0x88   :  { %s528_s19 = sshll.u32 %s1278_s28, 4 }
  0x89   :  { %p140_p2 = scmp.gt.s32.totalorder %s1159_s20, 0  ;;  %s125_s23 = scalar_lea.hbm %s1258_s1, %s528_s19 }
  0x8a   :  { %s877_s24 = scalar_lea.hbm %s125_s23, 16  ;;  %p880_p7 = scmp.lt.u32.totalorder %s125_s23, %s1258_s1 }
  0x8b   :  { %p160_p5 = scmp.gt.s32.totalorder %s1163_s13, 0  ;;  %p878_p6 = scmp.ne.s32.totalorder %s125_s23, %s877_s24 }
  0x8c   :  { %p881_p3 = scmp.lt.u32.totalorder %s1099_s29, %s877_s24  ;;  %p883_p8 = scmp.lt.u32.totalorder %s877_s24, %s125_s23 }
  0x8e   :  { %p882_p1 = por %p881_p3, %p880_p7 }
  0x90   :  { %p884_p9 = por %p883_p8, %p882_p1 }
  0x92   :  { %p885_p0 = pnand %p884_p9, %p878_p6 }
  0x94   :  { %888 = shalt.err (!%p885_p0)  }
  0x95   :  { %s889_s17 = scalar_lea.vmem %s136_s12, 16  ;;  %p894_p11 = scmp.lt.s32.totalorder %s136_s12, %s1082_s14 }
  0x96   :  { %p890_p10 = scmp.ne.s32.totalorder %s136_s12, %s889_s17  ;;  %p895_p12 = scmp.lt.s32.totalorder %s1108_s7, %s889_s17 }
  0x98   :  { %p896_p13 = por %p895_p12, %p894_p11 }
  0x9a   :  { %p897_p4 = pnand %p896_p13, %p890_p10 }
  0x9c   :  { %900 = shalt.err (!%p897_p4)  }
  0x9d   :  { %138 = dma.hbm_to_vmem [thread:$0]  %s125_s23, 16, %s136_s12, [#allocation3 + $0x4] }
  0x9e   :  { %s141_s18 = scalar_select %p140_p2, %s1159_s20, 0 }
  0x9f   :  { %s161_s27 = scalar_select %p160_p5, %s1163_s13, 0 }
  0xa0   :  { %p1262_p6 = scmp.lt.s32.totalorder %s1159_s20, 511  ;;  %p537_p7 = scmp.lt.s32.totalorder %s1163_s13, 511 }
  0xa1   :  { %s1187_s30 = sld [smem:[#allocation4 + $0x7]]  ;;  %s1027_s0 = smov [#allocation2 + $0x6]  }
  0xa2   :  { %s1280_s18 = smov (!%p1262_p6, %s141_s18), 511  ;;  %s175_s9 = sshll.u32 %s1027_s0, 4  ;;  %s176_s9 = int_to_ptr.vmem [resolvable:$true] %s175_s9 }
  0xa3   :  { %s535_s28 = sshll.u32 %s1280_s18, 4 }
  0xa4   :  { %s145_s8 = scalar_lea.hbm %s1258_s1, %s535_s28 }
  0xa5   :  { %s901_s10 = scalar_lea.hbm %s145_s8, 16  ;;  %p904_p2 = scmp.lt.u32.totalorder %s145_s8, %s1258_s1 }
  0xa6   :  { %p902_p4 = scmp.ne.s32.totalorder %s145_s8, %s901_s10  ;;  %p905_p5 = scmp.lt.u32.totalorder %s1099_s29, %s901_s10 }
  0xa7   :  { %p907_p1 = scmp.lt.u32.totalorder %s901_s10, %s145_s8 }
  0xa8   :  { %p906_p3 = por %p905_p5, %p904_p2 }
  0xaa   :  { %p908_p8 = por %p907_p1, %p906_p3 }
  0xac   :  { %p909_p9 = pnand %p908_p8, %p902_p4 }
  0xae   :  { %912 = shalt.err (!%p909_p9)  }
  0xaf   :  { %s913_s20 = scalar_lea.vmem %s156_s16, 16  ;;  %p918_p10 = scmp.lt.s32.totalorder %s156_s16, %s1082_s14 }
  0xb0   :  { %p914_p0 = scmp.ne.s32.totalorder %s156_s16, %s913_s20  ;;  %p919_p11 = scmp.lt.s32.totalorder %s1108_s7, %s913_s20 }
  0xb2   :  { %p920_p12 = por %p919_p11, %p918_p10 }
  0xb4   :  { %p921_p13 = pnand %p920_p12, %p914_p0 }
  0xb6   :  { %924 = shalt.err (!%p921_p13)  }
  0xb7   :  { %158 = dma.hbm_to_vmem [thread:$0]  %s145_s8, 16, %s156_s16, [#allocation3 + $0x5] }
  0xb8   :  { %s1282_s27 = smov (!%p537_p7, %s161_s27), 511  ;;  %p180_p6 = scmp.gt.s32.totalorder %s1187_s30, 0 }
  0xb9   :  { %s542_s12 = sshll.u32 %s1282_s27, 4 }
  0xba   :  { %s165_s21 = scalar_lea.hbm %s1258_s1, %s542_s12 }
  0xbb   :  { %s925_s22 = scalar_lea.hbm %s165_s21, 16  ;;  %p928_p2 = scmp.lt.u32.totalorder %s165_s21, %s1258_s1 }
  0xbc   :  { %p926_p4 = scmp.ne.s32.totalorder %s165_s21, %s925_s22  ;;  %p929_p5 = scmp.lt.u32.totalorder %s1099_s29, %s925_s22 }
  0xbd   :  { %p931_p1 = scmp.lt.u32.totalorder %s925_s22, %s165_s21 }
  0xbe   :  { %p930_p3 = por %p929_p5, %p928_p2 }
  0xc0   :  { %p932_p8 = por %p931_p1, %p930_p3 }
  0xc2   :  { %p933_p9 = pnand %p932_p8, %p926_p4 }
  0xc4   :  { %936 = shalt.err (!%p933_p9)  }
  0xc5   :  { %s937_s13 = scalar_lea.vmem %s176_s9, 16  ;;  %p942_p0 = scmp.lt.s32.totalorder %s176_s9, %s1082_s14 }
  0xc6   :  { %p938_p7 = scmp.ne.s32.totalorder %s176_s9, %s937_s13  ;;  %p943_p10 = scmp.lt.s32.totalorder %s1108_s7, %s937_s13 }
  0xc8   :  { %p944_p11 = por %p943_p10, %p942_p0 }
  0xca   :  { %p945_p12 = pnand %p944_p11, %p938_p7 }
  0xcc   :  { %948 = shalt.err (!%p945_p12)  }
  0xcd   :  { %178 = dma.hbm_to_vmem [thread:$0]  %s165_s21, 16, %s176_s9, [#allocation3 + $0x6] }
  0xce   :  { %s181_s16 = scalar_select %p180_p6, %s1187_s30, 0 }
  0xcf   :  { %p544_p13 = scmp.lt.s32.totalorder %s1187_s30, 511  ;;  %s1028_s25 = smov [#allocation2 + $0x7]  }
  0xd0   :  { %s195_s26 = sshll.u32 %s1028_s25, 4  ;;  %s196_s26 = int_to_ptr.vmem [resolvable:$true] %s195_s26 }
  0xd1   :  { %s1284_s16 = smov (!%p544_p13, %s181_s16), 511 }
  0xd2   :  { %s549_s17 = sshll.u32 %s1284_s16, 4 }
  0xd3   :  { %s185_s28 = scalar_lea.hbm %s1258_s1, %s549_s17 }
  0xd4   :  { %s949_s5 = scalar_lea.hbm %s185_s28, 16  ;;  %p952_p2 = scmp.lt.u32.totalorder %s185_s28, %s1258_s1 }
  0xd5   :  { %p950_p4 = scmp.ne.s32.totalorder %s185_s28, %s949_s5  ;;  %p953_p5 = scmp.lt.u32.totalorder %s1099_s29, %s949_s5 }
  0xd6   :  { %p955_p1 = scmp.lt.u32.totalorder %s949_s5, %s185_s28 }
  0xd7   :  { %p954_p3 = por %p953_p5, %p952_p2 }
  0xd9   :  { %p956_p6 = por %p955_p1, %p954_p3 }
  0xdb   :  { %p957_p8 = pnand %p956_p6, %p950_p4 }
  0xdd   :  { %960 = shalt.err (!%p957_p8)  }
  0xde   :  { %s961_s30 = scalar_lea.vmem %s196_s26, 16  ;;  %p966_p7 = scmp.lt.s32.totalorder %s196_s26, %s1082_s14 }
  0xdf   :  { %p962_p9 = scmp.ne.s32.totalorder %s196_s26, %s961_s30  ;;  %p967_p0 = scmp.lt.s32.totalorder %s1108_s7, %s961_s30 }
  0xe1   :  { %p968_p10 = por %p967_p0, %p966_p7 }
  0xe3   :  { %p969_p11 = pnand %p968_p10, %p962_p9 }
  0xe5   :  { %972 = shalt.err (!%p969_p11)  }
  0xe6   :  { %198 = dma.hbm_to_vmem [thread:$0]  %s185_s28, 16, %s196_s26, [#allocation3 + $0x7] }
  0xe7   :  { %999 = dma.done.wait [#allocation3], 16 }
  0xe8   :  { %1000 = vsyncadd [#allocation3], 4294967280 }
  0xe9   :  { %1001 = dma.done.wait [#allocation3 + $0x1], 16 }
  0xea   :  { %1002 = vsyncadd [#allocation3 + $0x1], 4294967280 }
  0xeb   :  { %1003 = dma.done.wait [#allocation3 + $0x2], 16 }
  0xec   :  { %1004 = vsyncadd [#allocation3 + $0x2], 4294967280 }
  0xed   :  { %1005 = dma.done.wait [#allocation3 + $0x3], 16 }
  0xee   :  { %1006 = vsyncadd [#allocation3 + $0x3], 4294967280 }
  0xef   :  { %1007 = dma.done.wait [#allocation3 + $0x4], 16 }
  0xf0   :  { %1008 = vsyncadd [#allocation3 + $0x4], 4294967280 }
  0xf1   :  { %1009 = dma.done.wait [#allocation3 + $0x5], 16 }
  0xf2   :  { %1010 = vsyncadd [#allocation3 + $0x5], 4294967280 }
  0xf3   :  { %1011 = dma.done.wait [#allocation3 + $0x6], 16 }
  0xf4   :  { %1012 = vsyncadd [#allocation3 + $0x6], 4294967280 }
  0xf5   :  { %1013 = dma.done.wait [#allocation3 + $0x7], 16 }
  0xf6   :  { %1014 = vsyncadd [#allocation3 + $0x7], 4294967280  ;;  %v1029_v0 = vmov 0.0|0.0   ;;  %vm1030_vm0 = vmmov 0   ;;  %v1031_v1 = vmov 0.0   ;;  %v217_v2 = vld [vmem:[#allocation8] sm:$0xff] }
  0xf7   :  { %681 = vmatprep.subr.bf16.mxu0 %v1029_v0  ;;  %643 = vmatprep.mubr.msk.f32.mxu0 %vm1030_vm0, %v1031_v1  ;;  %v218_v3 = vld [vmem:[#allocation8 + $0x8] sm:$0xff]  ;;  %v219_v4 = vld [vmem:[#allocation8 + $0x10] sm:$0xff]  ;;  %v220_v6 = vld [vmem:[#allocation8 + $0x18] sm:$0xff]  ;;  %s1032_s0 = smov [#allocation9]  }
  0xf8   :  { %705 = vmatprep.subr.bf16.mxu1 %v1029_v0  ;;  %678 = vmatprep.mubr.msk.f32.mxu1 %vm1030_vm0, %v1031_v1  ;;  %v682_v5 = vpack.c.bf16 %v218_v3, %v217_v2  ;;  %v685_v7 = vpack.c.bf16 %v220_v6, %v219_v4  ;;  %v221_v8 = vld [vmem:[#allocation8 + $0x20] sm:$0xff]  ;;  %v222_v9 = vld [vmem:[#allocation8 + $0x28] sm:$0xff]  ;;  %v223_v11 = vld [vmem:[#allocation8 + $0x30] sm:$0xff]  ;;  %s414_s9 = sshll.u32 %s1032_s0, 4  ;;  %s415_s9 = int_to_ptr.vmem [resolvable:$true] %s414_s9 }
  0xf9   :  { %v688_v10 = vpack.c.bf16 %v222_v9, %v221_v8  ;;  %v224_v12 = vld [vmem:[#allocation8 + $0x38] sm:$0xff]  ;;  %v225_v14 = vld [vmem:[#allocation8 + $0x40] sm:$0xff]  ;;  %v226_v15 = vld [vmem:[#allocation8 + $0x48] sm:$0xff]  ;;  %s973_s10 = scalar_lea.vmem %s415_s9, 128  ;;  %p978_p13 = scmp.lt.s32.totalorder %s415_s9, %s415_s9 }
  0xfa   :  { %683 = vmatpush3.bf16.msra.mxu0 %v682_v5  ;;  %v691_v13 = vpack.c.bf16 %v224_v12, %v223_v11  ;;  %v694_v16 = vpack.c.bf16 %v226_v15, %v225_v14  ;;  %v227_v17 = vld [vmem:[#allocation8 + $0x50] sm:$0xff]  ;;  %v228_v18 = vld [vmem:[#allocation8 + $0x58] sm:$0xff]  ;;  %v229_v20 = vld [vmem:[#allocation8 + $0x60] sm:$0xff]  ;;  %p974_p12 = scmp.ne.s32.totalorder %s415_s9, %s973_s10  ;;  %p979_p4 = scmp.lt.s32.totalorder %s973_s10, %s973_s10 }
  0xfb   :  { %684 = vmatprep.subr.bf16.mxu0 %v1029_v0  ;;  %v697_v19 = vpack.c.bf16 %v228_v18, %v227_v17  ;;  %v230_v21 = vld [vmem:[#allocation8 + $0x68] sm:$0xff]  ;;  %v231_v23 = vld [vmem:[#allocation8 + $0x70] sm:$0xff]  ;;  %v232_v24 = vld [vmem:[#allocation8 + $0x78] sm:$0xff] }
  0xfc   :  { %v700_v22 = vpack.c.bf16 %v230_v21, %v229_v20  ;;  %v703_v25 = vpack.c.bf16 %v232_v24, %v231_v23  ;;  %v216_v26 = vld [vmem:[#allocation2] sm:$0xff]  ;;  %v234_v27 = vld [vmem:[#allocation8 + $0x80] sm:$0xff]  ;;  %v235_v28 = vld [vmem:[#allocation8 + $0x88] sm:$0xff]  ;;  %p980_p2 = por %p979_p4, %p978_p13 }
  0xfd   :  { %v706_v29 = vpack.c.bf16 %v235_v28, %v234_v27  ;;  %v236_v30 = vld [vmem:[#allocation8 + $0x90] sm:$0xff]  ;;  %v237_v31 = vld [vmem:[#allocation8 + $0x98] sm:$0xff]  ;;  %v238_v33 = vld [vmem:[#allocation8 + $0xa0] sm:$0xff] }
  0xfe   :  { %686 = vmatpush3.bf16.msra.mxu0 %v685_v7  ;;  %v709_v32 = vpack.c.bf16 %v237_v31, %v236_v30  ;;  %v239_v34 = vld [vmem:[#allocation8 + $0xa8] sm:$0xff]  ;;  %v240_v36 = vld [vmem:[#allocation8 + $0xb0] sm:$0xff]  ;;  %v241_v37 = vld [vmem:[#allocation8 + $0xb8] sm:$0xff]  ;;  %p981_p5 = pnand %p980_p2, %p974_p12 }
  0xff   :  { %687 = vmatprep.subr.bf16.mxu0 %v1029_v0  ;;  %707 = vmatpush3.bf16.msra.mxu1 %v706_v29  ;;  %v712_v35 = vpack.c.bf16 %v239_v34, %v238_v33  ;;  %v715_v38 = vpack.c.bf16 %v241_v37, %v240_v36  ;;  %v242_v39 = vld [vmem:[#allocation8 + $0xc0] sm:$0xff]  ;;  %v243_v40 = vld [vmem:[#allocation8 + $0xc8] sm:$0xff]  ;;  %v244_v42 = vld [vmem:[#allocation8 + $0xd0] sm:$0xff] }
 0x100   :  { %708 = vmatprep.subr.bf16.mxu1 %v1029_v0  ;;  %v718_v41 = vpack.c.bf16 %v243_v40, %v242_v39  ;;  %v245_v43 = vld [vmem:[#allocation8 + $0xd8] sm:$0xff]  ;;  %v246_v45 = vld [vmem:[#allocation8 + $0xe0] sm:$0xff]  ;;  %v247_v46 = vld [vmem:[#allocation8 + $0xe8] sm:$0xff] }
 0x101   :  { %v721_v44 = vpack.c.bf16 %v245_v43, %v244_v42  ;;  %v724_v47 = vpack.c.bf16 %v247_v46, %v246_v45  ;;  %v248_v48 = vld [vmem:[#allocation8 + $0xf0] sm:$0xff]  ;;  %v249_v49 = vld [vmem:[#allocation8 + $0xf8] sm:$0xff] }
 0x102   :  { %689 = vmatpush3.bf16.msra.mxu0 %v688_v10  ;;  %v727_v50 = vpack.c.bf16 %v249_v49, %v248_v48  ;;  %v550_v51 = vld [vmem:[%s1260_s3] ss:$0 sm:$0xff]  ;;  %v552_v60 = vld [vmem:[%s1260_s3 + $0x1] ss:$0 sm:$0xff] }
 0x103   :  { %690 = vmatprep.subr.bf16.mxu0 %v1029_v0  ;;  %710 = vmatpush3.bf16.msra.mxu1 %v709_v32 }
 0x104   :  { %711 = vmatprep.subr.bf16.mxu1 %v1029_v0 }
 0x106   :  { %692 = vmatpush3.bf16.msra.mxu0 %v691_v13 }
 0x107   :  { %693 = vmatprep.subr.bf16.mxu0 %v1029_v0  ;;  %713 = vmatpush3.bf16.msra.mxu1 %v712_v35 }
 0x108   :  { %714 = vmatprep.subr.bf16.mxu1 %v1029_v0 }
 0x10a   :  { %695 = vmatpush3.bf16.msra.mxu0 %v694_v16 }
 0x10b   :  { %696 = vmatprep.subr.bf16.mxu0 %v1029_v0  ;;  %716 = vmatpush3.bf16.msra.mxu1 %v715_v38 }
 0x10c   :  { %717 = vmatprep.subr.bf16.mxu1 %v1029_v0 }
 0x10e   :  { %698 = vmatpush3.bf16.msra.mxu0 %v697_v19 }
 0x10f   :  { %699 = vmatprep.subr.bf16.mxu0 %v1029_v0  ;;  %719 = vmatpush3.bf16.msra.mxu1 %v718_v41 }
 0x110   :  { %720 = vmatprep.subr.bf16.mxu1 %v1029_v0 }
 0x112   :  { %701 = vmatpush3.bf16.msra.mxu0 %v700_v22 }
 0x113   :  { %702 = vmatprep.subr.bf16.mxu0 %v1029_v0  ;;  %722 = vmatpush3.bf16.msra.mxu1 %v721_v44 }
 0x114   :  { %723 = vmatprep.subr.bf16.mxu1 %v1029_v0 }
 0x116   :  { %704 = vmatpush3.bf16.msra.mxu0 %v703_v25 }
 0x117   :  { %725 = vmatpush3.bf16.msra.mxu1 %v724_v47 }
 0x118   :  { %726 = vmatprep.subr.bf16.mxu1 %v1029_v0 }
 0x119   :  { %644 = vmatmul.mubr.f32.vlgmr.msra.gmra.mrb[0].mxu0 %v216_v26 }
 0x11b   :  { %728 = vmatpush3.bf16.msra.mxu1 %v727_v50 }
 0x1ec   :  { %v321_v52 = vpop.f32.mrb[0].mxu0 }
 0x1ed   :  { %v322_v53 = vadd.f32 %v550_v51, %v321_v52  ;;  %v645_v54 = vpop.f32.mrb[1].mxu0 }
 0x1ef   :  { %v551_v55 = vmul.f32 -1.442695, %v322_v53 }
 0x1f1   :  { %745 = vpow2.f32 %v551_v55 }
 0x1fb   :  { %v746_v56 = vpop.eup %745 }
 0x1fc   :  { %v328_v57 = vadd.f32 1.0, %v746_v56 }
 0x1fe   :  { %747 = vrcp.f32 %v328_v57 }
 0x208   :  { %v748_v58 = vpop.eup %747 }
 0x209   :  { %v331_v59 = vmul.f32 %v748_v58, %v322_v53 }
 0x20b   :  { %679 = vmatmul.mubr.f32.vlgmr.msra.gmra.mrb[0].mxu1 %v331_v59 }
 0x2de   :  { %v403_v61 = vpop.f32.mrb[0].mxu1 }
 0x2df   :  { %v404_v62 = vadd.f32 %v552_v60, %v403_v61  ;;  %v680_v63 = vpop.f32.mrb[1].mxu1 }
 0x2e1   :  { %407 = vst [vmem:[#allocation9] sm:$0xff] %v404_v62 }
 0x2e2   :  { %984 = shalt.err (!%p981_p5)
}
 0x2e3   :  { %s985_s20 = scalar_lea.hbm %s1261_s4, 128 }
 0x2e4   :  { %p986_p3 = scmp.ne.s32.totalorder %s1261_s4, %s985_s20  ;;  %p989_p1 = scmp.lt.u32.totalorder %s985_s20, %s1261_s4 }
 0x2e6   :  { %p991_p6 = pnand %p989_p1, %p986_p3 }
 0x2e8   :  { %994 = shalt.err (!%p991_p6)
}
 0x2e9   :  { %417 = dma.vmem_to_hbm [thread:$0]  %s415_s9, 128, %s1261_s4, [#allocation6]  }
 0x2ea   :  { %1015 = dma.done.wait [#allocation6], 128  }
 0x2eb   :  { %1016 = vsyncadd [#allocation6], 4294967168 }
 0x2ec   :  { %421 = vsyncpa [#allocation5], 1 }
 0x2ed   :  { %422 = vsyncpa [#allocation6], 1 }
 0x2ee   :  { %423 = vsyncpa [#allocation7], 1 }
 0x2ef   :  { %424 = vsyncmov [#allocation3] }
 0x2f2   :  { %s425_s23 = vpop.sfrf %424 }
 0x2f3   :  { %p553_p8 = scmp.ne.s32.totalorder %s425_s23, 0 }
 0x2f5   :  { %429 = shalt.err (%p553_p8)  }
 0x2f6   :  { %431 = vsyncmov [#allocation3 + $0x1] }
 0x2f9   :  { %s432_s24 = vpop.sfrf %431 }
 0x2fa   :  { %p554_p9 = scmp.ne.s32.totalorder %s432_s24, 0 }
 0x2fc   :  { %436 = shalt.err (%p554_p9)  }
 0x2fd   :  { %438 = vsyncmov [#allocation3 + $0x2] }
 0x300   :  { %s439_s13 = vpop.sfrf %438 }
 0x301   :  { %p555_p7 = scmp.ne.s32.totalorder %s439_s13, 0 }
 0x303   :  { %443 = shalt.err (%p555_p7)  }
 0x304   :  { %445 = vsyncmov [#allocation3 + $0x3] }
 0x307   :  { %s446_s16 = vpop.sfrf %445 }
 0x308   :  { %p556_p0 = scmp.ne.s32.totalorder %s446_s16, 0 }
 0x30a   :  { %450 = shalt.err (%p556_p0)  }
 0x30b   :  { %452 = vsyncmov [#allocation3 + $0x4] }
 0x30e   :  { %s453_s4 = vpop.sfrf %452 }
 0x30f   :  { %p557_p10 = scmp.ne.s32.totalorder %s453_s4, 0 }
 0x311   :  { %457 = shalt.err (%p557_p10)  }
 0x312   :  { %459 = vsyncmov [#allocation3 + $0x5] }
 0x315   :  { %s460_s25 = vpop.sfrf %459 }
 0x316   :  { %p558_p11 = scmp.ne.s32.totalorder %s460_s25, 0 }
 0x318   :  { %464 = shalt.err (%p558_p11)  }
 0x319   :  { %466 = vsyncmov [#allocation3 + $0x6] }
 0x31c   :  { %s467_s26 = vpop.sfrf %466 }
 0x31d   :  { %p559_p12 = scmp.ne.s32.totalorder %s467_s26, 0 }
 0x31f   :  { %471 = shalt.err (%p559_p12)  }
 0x320   :  { %473 = vsyncmov [#allocation3 + $0x7] }
 0x323   :  { %s474_s17 = vpop.sfrf %473 }
 0x324   :  { %p560_p13 = scmp.ne.s32.totalorder %s474_s17, 0 }
 0x326   :  { %478 = shalt.err (%p560_p13)  }

</bundles_post_ra>
